<compile_context>
chip_gen: v5e
topology: v5e:2x2
jax: 0.10.0
libtpu: 0.0.40
codegen_flags: <defaults>
</compile_context>

<pallas_src>
import functools
from typing import NamedTuple

import jax
import jax.numpy as jnp
from jax.experimental import pallas as pl
from jax.experimental.pallas import tpu as pltpu


def _round_up(x, m):
    return (x + m - 1) // m * m


class PhiParams(NamedTuple):
    w1_p: jax.Array   # (d_in, h_pad)   hidden padded to a multiple of 128
    b1_p: jax.Array   # (1, h_pad)
    w2_p: jax.Array   # (h_pad, o_pad)  MXU-friendly padded second-layer weight
    b2_2d: jax.Array  # (1, d_out)      unpadded bias (output stays unpadded in HBM)
    d_in: int
    hidden: int
    d_out: int


def prepare_phi_params(w1, b1, w2, b2):
    """Pad weights once at init (hoisted out of the per-call path).

    Padded hidden columns have zero weight + zero bias -> relu(0) = 0, and
    padded W2 rows are zero, so results are exact; padded W2 columns are
    dropped inside the kernel before the store.
    """
    d_in, hidden = w1.shape
    _, d_out = w2.shape
    h_pad = _round_up(hidden, 128)
    o_pad = _round_up(d_out, 128)
    w1_p = jnp.zeros((d_in, h_pad), jnp.float32).at[:, :hidden].set(w1)
    b1_p = jnp.zeros((1, h_pad), jnp.float32).at[:, :hidden].set(b1)
    w2_p = jnp.zeros((h_pad, o_pad), jnp.float32).at[:hidden, :d_out].set(w2)
    b2_2d = jnp.asarray(b2, jnp.float32).reshape(1, d_out)
    return PhiParams(w1_p, b1_p, w2_p, b2_2d, d_in, hidden, d_out)


def phi_kernel(x_ref, w1_ref, b1_ref, w2_ref, b2_ref, o_ref, *, d_in, d_out):
    # ---- Layer 1: y1 = relu(x @ W1 + b1).  K = d_in is tiny (2), so compute
    # it on the VPU as broadcasted multiply-adds instead of pushing a
    # degenerate [TM,2]x[2,H] tile through the MXU.
    x = x_ref[...]                              # (TM, d_in)      f32
    w1 = w1_ref[...]                            # (d_in, h_pad)   f32
    h = b1_ref[...]                             # (1, h_pad) broadcasts over rows
    for d in range(d_in):                       # static unroll; d_in is tiny
        h = h + x[:, d:d + 1] * w1[d:d + 1, :]  # (TM,1)*(1,h_pad) -> (TM,h_pad)
    h = jnp.maximum(h, 0.0)

    # ---- Layer 2: lane-dense 128-wide MXU matmul, f32 accumulation.
    y = jnp.dot(h, w2_ref[...], preferred_element_type=jnp.float32)  # (TM, o_pad)

    # ---- Store only the real d_out columns: HBM writeback stays unpadded.
    o_ref[...] = (y[:, :d_out] + b2_ref[...]).astype(o_ref.dtype)


def _choose_tiling(batch, *, max_tm=2048, min_tm=8, target_steps=4):
    """Pick (tm, grid_steps).

    Big tiles amortize the ~0.35us/step overhead; at large batch we keep
    >= target_steps steps so the 'parallel' batch axis can be split across
    the two v7x TensorCores (no-op on 1-TC v5e/v6e); cdiv-based sizing keeps
    the row-tail padding small (e.g. B=1030 -> 1056, not 1536).
    """
    if batch <= min_tm:
        return min_tm, 1
    steps = max(pl.cdiv(batch, max_tm),
                min(target_steps, pl.cdiv(batch, min_tm)))
    tm = _round_up(pl.cdiv(batch, steps), 8)
    steps = pl.cdiv(batch, tm)
    return tm, steps


def phi_model(x, params: PhiParams):
    """Pallas forward pass. x: [B, d_in] f32 -> [B, d_out] f32."""
    B, d_in = x.shape
    assert d_in == params.d_in
    d_out = params.d_out
    h_pad = params.w1_p.shape[1]
    o_pad = params.w2_p.shape[1]

    tm, steps = _choose_tiling(B)
    b_padded = tm * steps
    x_p = x if b_padded == B else jnp.zeros((b_padded, d_in), x.dtype).at[:B].set(x)

    flops = 2 * b_padded * (d_in * h_pad + h_pad * o_pad)
    bytes_accessed = 4 * (b_padded * d_in + d_in * h_pad + h_pad
                          + h_pad * o_pad + d_out + b_padded * d_out)

    out = pl.pallas_call(
        functools.partial(phi_kernel, d_in=d_in, d_out=d_out),
        out_shape=jax.ShapeDtypeStruct((b_padded, d_out), jnp.float32),
        grid=(steps,),
        in_specs=[
            pl.BlockSpec((tm, d_in), lambda i: (i, 0)),      # x: tiled over rows
            pl.BlockSpec((d_in, h_pad), lambda i: (0, 0)),   # W1: VMEM-resident
            pl.BlockSpec((1, h_pad), lambda i: (0, 0)),      # b1
            pl.BlockSpec((h_pad, o_pad), lambda i: (0, 0)),  # W2
            pl.BlockSpec((1, d_out), lambda i: (0, 0)),      # b2 (unpadded)
        ],
        # Last block dim == full array dim (d_out) -> legal and unpadded in HBM.
        out_specs=pl.BlockSpec((tm, d_out), lambda i: (i, 0)),
        compiler_params=pltpu.CompilerParams(
            dimension_semantics=("parallel",)),
        cost_estimate=pl.CostEstimate(
            flops=flops, transcendentals=0, bytes_accessed=bytes_accessed),
    )(x_p, params.w1_p, params.b1_p, params.w2_p, params.b2_2d)
    return out if b_padded == B else out[:B]


def phi_model_ref(x, w1, b1, w2, b2):
    h = jnp.maximum(x @ w1 + b1, 0.0)
    return h @ w2 + b2


def phi_model_auto(x, params: PhiParams, raw_params, *, min_pallas_batch=1024):
    """Tiny-batch bypass: below ~1K rows the fused XLA expression is strictly
    faster than a pallas_call launch; use the kernel only for big batches."""
    if x.shape[0] < min_pallas_batch:
        w1, b1, w2, b2 = raw_params
        return phi_model_ref(x, w1, b1, w2, b2)
    return phi_model(x, params)


if __name__ == "__main__":
    input_dim = 2     # data_x.size(1) for the Van der Pol example (2 states)
    hidden_dim = 64
    output_dim = 9
    batch = 8

    key = jax.random.PRNGKey(0)
    kx, k1, k2, k3, k4 = jax.random.split(key, 5)

    # Mimic PyTorch Linear init: U(-1/sqrt(fan_in), 1/sqrt(fan_in)).
    lim1 = 1.0 / jnp.sqrt(input_dim)
    lim2 = 1.0 / jnp.sqrt(hidden_dim)
    w1 = jax.random.uniform(k1, (input_dim, hidden_dim), jnp.float32, -lim1, lim1)
    b1 = jax.random.uniform(k2, (hidden_dim,), jnp.float32, -lim1, lim1)
    w2 = jax.random.uniform(k3, (hidden_dim, output_dim), jnp.float32, -lim2, lim2)
    b2 = jax.random.uniform(k4, (output_dim,), jnp.float32, -lim2, lim2)

    # Padding hoisted out of the per-call path: done exactly once here.
    params = prepare_phi_params(w1, b1, w2, b2)

    # Small batch (matches the module's usage) -- run the Pallas kernel path.
    x = jax.random.normal(kx, (batch, input_dim), jnp.float32)
    out = jax.block_until_ready(phi_model(x, params))
    ref = phi_model_ref(x, w1, b1, w2, b2)
    assert out.shape == (batch, output_dim)
    assert jnp.allclose(out, ref, atol=1e-5, rtol=1e-5)

    # Tiny-batch dispatcher should agree as well (uses the fused XLA path).
    out_auto = jax.block_until_ready(phi_model_auto(x, params, (w1, b1, w2, b2)))
    assert jnp.allclose(out_auto, ref, atol=1e-5, rtol=1e-5)

    # Larger, non-multiple batch: exercises multi-step grid + row-tail padding.
    x_big = jax.random.normal(kx, (1030, input_dim), jnp.float32)
    out_big = jax.block_until_ready(phi_model(x_big, params))
    ref_big = phi_model_ref(x_big, w1, b1, w2, b2)
    assert out_big.shape == (1030, output_dim)
    assert jnp.allclose(out_big, ref_big, atol=1e-5, rtol=1e-5)

    print("KERNEL_OK")
</pallas_src>

<mosaic_0001>
module attributes {stable_mosaic.version = 11 : i64} {
  func.func @phi_kernel(%arg0: i32, %arg1: memref<8x2xf32, #tpu.memory_space<vmem>>, %arg2: memref<2x128xf32, #tpu.memory_space<vmem>>, %arg3: memref<1x128xf32, #tpu.memory_space<vmem>>, %arg4: memref<128x128xf32, #tpu.memory_space<vmem>>, %arg5: memref<1x9xf32, #tpu.memory_space<vmem>>, %arg6: memref<8x9xf32, #tpu.memory_space<vmem>>) attributes {dimension_semantics = [#tpu.dimension_semantics<parallel>], iteration_bounds = array<i64: 1>, scalar_prefetch = 0 : i64, scratch_operands = 0 : i64, tpu.core_type = #tpu.core_type<tc>, window_params = [{transform_indices = @transform_0, window_bounds = array<i64: 8, 2>}, {pipeline_mode = #tpu.pipeline_mode<synchronous>, transform_indices = @transform_1, window_bounds = array<i64: 2, 128>}, {pipeline_mode = #tpu.pipeline_mode<synchronous>, transform_indices = @transform_2, window_bounds = array<i64: 1, 128>}, {pipeline_mode = #tpu.pipeline_mode<synchronous>, transform_indices = @transform_3, window_bounds = array<i64: 128, 128>}, {pipeline_mode = #tpu.pipeline_mode<synchronous>, transform_indices = @transform_4, window_bounds = array<i64: 1, 9>}, {transform_indices = @transform_5, window_bounds = array<i64: 8, 9>}]} {
    %c0 = arith.constant 0 : index
    %c0_0 = arith.constant 0 : index
    %0 = vector.load %arg1[%c0, %c0_0] : memref<8x2xf32, #tpu.memory_space<vmem>>, vector<8x2xf32>
    %c0_1 = arith.constant 0 : index
    %c0_2 = arith.constant 0 : index
    %1 = vector.load %arg2[%c0_1, %c0_2] : memref<2x128xf32, #tpu.memory_space<vmem>>, vector<2x128xf32>
    %c0_3 = arith.constant 0 : index
    %c0_4 = arith.constant 0 : index
    %2 = vector.load %arg3[%c0_3, %c0_4] : memref<1x128xf32, #tpu.memory_space<vmem>>, vector<1x128xf32>
    %3 = vector.extract_strided_slice %0 {offsets = [0, 0], sizes = [8, 1], strides = [1, 1]} : vector<8x2xf32> to vector<8x1xf32>
    %4 = vector.extract_strided_slice %1 {offsets = [0, 0], sizes = [1, 128], strides = [1, 1]} : vector<2x128xf32> to vector<1x128xf32>
    %5 = vector.broadcast %3 : vector<8x1xf32> to vector<8x128xf32>
    %6 = vector.broadcast %4 : vector<1x128xf32> to vector<8x128xf32>
    %7 = arith.mulf %5, %6 : vector<8x128xf32>
    %8 = vector.broadcast %2 : vector<1x128xf32> to vector<8x128xf32>
    %9 = arith.addf %8, %7 : vector<8x128xf32>
    %10 = vector.extract_strided_slice %0 {offsets = [0, 1], sizes = [8, 1], strides = [1, 1]} : vector<8x2xf32> to vector<8x1xf32>
    %11 = vector.extract_strided_slice %1 {offsets = [1, 0], sizes = [1, 128], strides = [1, 1]} : vector<2x128xf32> to vector<1x128xf32>
    %12 = vector.broadcast %10 : vector<8x1xf32> to vector<8x128xf32>
    %13 = vector.broadcast %11 : vector<1x128xf32> to vector<8x128xf32>
    %14 = arith.mulf %12, %13 : vector<8x128xf32>
    %15 = arith.addf %9, %14 : vector<8x128xf32>
    %cst = arith.constant 0.000000e+00 : f32
    %16 = vector.broadcast %cst : f32 to vector<8x128xf32>
    %17 = arith.maximumf %15, %16 : vector<8x128xf32>
    %c0_5 = arith.constant 0 : index
    %c0_6 = arith.constant 0 : index
    %18 = vector.load %arg4[%c0_5, %c0_6] : memref<128x128xf32, #tpu.memory_space<vmem>>, vector<128x128xf32>
    %cst_7 = arith.constant dense<0.000000e+00> : vector<8x128xf32>
    %19 = tpu.matmul %17, %18, %cst_7 {dimension_numbers = #tpu.dot_dimension_numbers<[1], [0], [0], [1], [0, 0, 1, 1], [], []>} : vector<8x128xf32>, vector<128x128xf32>, vector<8x128xf32> -> vector<8x128xf32>
    %20 = vector.extract_strided_slice %19 {offsets = [0, 0], sizes = [8, 9], strides = [1, 1]} : vector<8x128xf32> to vector<8x9xf32>
    %c0_8 = arith.constant 0 : index
    %c0_9 = arith.constant 0 : index
    %21 = vector.load %arg5[%c0_8, %c0_9] : memref<1x9xf32, #tpu.memory_space<vmem>>, vector<1x9xf32>
    %22 = vector.broadcast %21 : vector<1x9xf32> to vector<8x9xf32>
    %23 = arith.addf %20, %22 : vector<8x9xf32>
    %c0_10 = arith.constant 0 : index
    %c0_11 = arith.constant 0 : index
    %24 = vector.load %arg6[%c0_10, %c0_11] : memref<8x9xf32, #tpu.memory_space<vmem>>, vector<8x9xf32>
    tpu.vector_store %arg6[%c0_10, %c0_11], %23 {strides = array<i32>} : memref<8x9xf32, #tpu.memory_space<vmem>>, vector<8x9xf32>,
    return
  }
  func.func @transform_0(%arg0: i32) -> (i32, i32) {
    %c0_i32 = arith.constant 0 : i32
    %c0_i32_0 = arith.constant 0 : i32
    return %arg0, %c0_i32 : i32, i32
  }
  func.func @transform_1(%arg0: i32) -> (i32, i32) {
    %c0_i32 = arith.constant 0 : i32
    %c0_i32_0 = arith.constant 0 : i32
    %c0_i32_1 = arith.constant 0 : i32
    return %c0_i32, %c0_i32_0 : i32, i32
  }
  func.func @transform_2(%arg0: i32) -> (i32, i32) {
    %c0_i32 = arith.constant 0 : i32
    %c0_i32_0 = arith.constant 0 : i32
    %c0_i32_1 = arith.constant 0 : i32
    return %c0_i32, %c0_i32_0 : i32, i32
  }
  func.func @transform_3(%arg0: i32) -> (i32, i32) {
    %c0_i32 = arith.constant 0 : i32
    %c0_i32_0 = arith.constant 0 : i32
    %c0_i32_1 = arith.constant 0 : i32
    return %c0_i32, %c0_i32_0 : i32, i32
  }
  func.func @transform_4(%arg0: i32) -> (i32, i32) {
    %c0_i32 = arith.constant 0 : i32
    %c0_i32_0 = arith.constant 0 : i32
    %c0_i32_1 = arith.constant 0 : i32
    return %c0_i32, %c0_i32_0 : i32, i32
  }
  func.func @transform_5(%arg0: i32) -> (i32, i32) {
    %c0_i32 = arith.constant 0 : i32
    %c0_i32_0 = arith.constant 0 : i32
    return %arg0, %c0_i32 : i32, i32
  }
}

</mosaic_0001>

<bundles_post_ra>
// kernel: tpu_custom_call.1
= control target key start
LH: loop header
LB: loop body
LE: loop exit
PB: predicated region body
PF: predicated region fallthrough
CT: control target
= control target key end

     0   :  { %10 = vsyncpa [#allocation3], 0  ;;  %s235_s0 = inlined_call_operand.vmem [shape: f32[8,2], index: 0, kind: input, shape index: {}]   ;;  %s236_s1 = inlined_call_operand.vmem [shape: f32[2,128], index: 1, kind: input, shape index: {}]   ;;  %s237_s2 = inlined_call_operand.vmem [shape: f32[1,128], index: 2, kind: input, shape index: {}]   ;;  %s238_s3 = inlined_call_operand.hbm [shape: f32[128,128], index: 3, kind: input, shape index: {}]   ;;  %s239_s4 = inlined_call_operand.vmem [shape: f32[1,9], index: 4, kind: input, shape index: {}]   ;;  %s240_s5 = inlined_call_operand.hbm [shape: f32[8,9], index: 5, kind: output, shape index: {}]  }
   0x1   :  { %11 = vsyncpa [#allocation4], 0  ;;  %s22_s20 = sshll.u32 %s238_s3, 4  ;;  %s181_s21 = smov [#allocation2]   ;;  %s23_s20 = int_to_ptr.hbm [resolvable:$true] %s22_s20 }
   0x2   :  { %s24_s22 = sshll.u32 %s181_s21, 4  ;;  %s182_s23 = smov 128   ;;  %s25_s22 = int_to_ptr.vmem [resolvable:$true] %s24_s22 }
   0x3   :  { %s183_s24 = smov 8  }
   0x4   :  { %30 = dma.hbm_to_vmem [thread:$0]  %s23_s20, 2048, %s25_s22, [#allocation3], %s182_s23, %s182_s23, %s183_s24  }
   0x5   :  { %177 = dma.done.wait [#allocation3], 2048  }
   0x6   :  { %178 = vsyncadd [#allocation3], 4294965248  ;;  %v184_v0 = vmov 0   ;;  %v37_v1 = vld [vmem:[%s235_s0] sm:$0xff]  ;;  %v74_v2 = vld [vmem:[#allocation2 + $0x78] sm:$0xff]  ;;  %v185_v8 = vmov 1  }
   0x7   :  { %125 = vset.pattern.permute.xlu0 %v184_v0  ;;  %v73_v3 = vld [vmem:[#allocation2 + $0x70] sm:$0xff]  ;;  %75 = vmatpush.msra.mxu0 %v74_v2  ;;  %v72_v4 = vld [vmem:[#allocation2 + $0x68] sm:$0xff]  ;;  %v71_v5 = vld [vmem:[#allocation2 + $0x60] sm:$0xff]  ;;  %s186_s6 = smov [#allocation5]   ;;  %s109_s9 = sshll.u32 %s240_s5, 4  ;;  %vm100_vm0 = vcmask 72704   ;;  %s110_s9 = int_to_ptr.hbm [resolvable:$true] %s109_s9 }
   0x8   :  { %42 = vperm.xlu0 %125, %v37_v1   ;;  %v70_v6 = vld [vmem:[#allocation2 + $0x58] sm:$0xff]  ;;  %v69_v7 = vld [vmem:[#allocation2 + $0x50] sm:$0xff]  ;;  %v68_v9 = vld [vmem:[#allocation2 + $0x48] sm:$0xff] }
   0x9   :  { %76 = vmatpush.msra.mxu0 %v73_v3  ;;  %v67_v10 = vld [vmem:[#allocation2 + $0x40] sm:$0xff]  ;;  %v66_v11 = vld [vmem:[#allocation2 + $0x38] sm:$0xff]  ;;  %v65_v12 = vld [vmem:[#allocation2 + $0x30] sm:$0xff] }
   0xa   :  { %v64_v13 = vld [vmem:[#allocation2 + $0x28] sm:$0xff]  ;;  %v63_v14 = vld [vmem:[#allocation2 + $0x20] sm:$0xff]  ;;  %v62_v15 = vld [vmem:[#allocation2 + $0x18] sm:$0xff] }
   0xb   :  { %77 = vmatpush.msra.mxu0 %v72_v4  ;;  %v61_v16 = vld [vmem:[#allocation2 + $0x10] sm:$0xff]  ;;  %v60_v17 = vld [vmem:[#allocation2 + $0x8] sm:$0xff]  ;;  %v59_v18 = vld [vmem:[#allocation2] sm:$0xff] }
   0xc   :  { %v38_v19 = vld [vmem:[%s236_s1] sm:$0x3]  ;;  %s107_s1 = sshll.u32 %s186_s6, 4  ;;  %s108_s1 = int_to_ptr.vmem [resolvable:$true] %s107_s1 }
   0xd   :  { %78 = vmatpush.msra.mxu0 %v71_v5  ;;  %v45_v21 = vperm.slane %v38_v19, 0  ;;  %v127_v22 = vld [vmem:[%s237_s2] ss:$0 sm:$0xff]  ;;  %v55_v24 = vperm.slane %v38_v19, 1 }
   0xe   :  { %v128_v30 = vld [vmem:[%s239_s4] ss:$0 sm:$0xff] }
   0xf   :  { %79 = vmatpush.msra.mxu0 %v70_v6 }
  0x10   :  { %126 = vset.pattern.permute.xlu0 %v185_v8 }
  0x11   :  { %52 = vperm.xlu0 %126, %v37_v1   ;;  %80 = vmatpush.msra.mxu0 %v69_v7 }
  0x13   :  { %81 = vmatpush.msra.mxu0 %v68_v9 }
  0x15   :  { %82 = vmatpush.msra.mxu0 %v67_v10 }
  0x17   :  { %83 = vmatpush.msra.mxu0 %v66_v11 }
  0x19   :  { %84 = vmatpush.msra.mxu0 %v65_v12 }
  0x1b   :  { %85 = vmatpush.msra.mxu0 %v64_v13 }
  0x1d   :  { %86 = vmatpush.msra.mxu0 %v63_v14 }
  0x1f   :  { %87 = vmatpush.msra.mxu0 %v62_v15 }
  0x21   :  { %88 = vmatpush.msra.mxu0 %v61_v16 }
  0x23   :  { %89 = vmatpush.msra.mxu0 %v60_v17 }
  0x25   :  { %90 = vmatpush.msra.mxu0 %v59_v18 }
  0x7a   :  { %v43_v20 = vpop.permute.xlu0 %42 }
  0x7b   :  { %v46_v23 = vmul.f32 %v45_v21, %v43_v20 }
  0x7d   :  { %v50_v26 = vadd.f32 %v127_v22, %v46_v23 }
  0x83   :  { %v53_v25 = vpop.permute.xlu0 %52 }
  0x84   :  { %v56_v27 = vmul.f32 %v55_v24, %v53_v25 }
  0x86   :  { %v57_v28 = vadd.f32 %v56_v27, %v50_v26 }
  0x88   :  { %v58_v29 = vmax.f32 %v57_v28, 0.0 }
  0x8a   :  { %91 = vmatmul.f32.vlgmr.msra.gmra.mxu0 %v58_v29 }
 0x107   :  { %v92_v31 = vpop.f32.mrf.mxu0 }
 0x108   :  { %v99_v32 = vadd.f32 %v128_v30, %v92_v31 }
 0x10a   :  { %101 = vst.msk [vmem:[#allocation5] sm:$0xff] %vm100_vm0, %v99_v32 }
 0x10b   :  { %112 = dma.vmem_to_hbm [thread:$0]  %s108_s1, 128, %s110_s9, [#allocation4]  }
 0x10c   :  { %179 = dma.done.wait [#allocation4], 128  }
 0x10d   :  { %180 = vsyncadd [#allocation4], 4294967168 }
 0x10e   :  { %117 = vsyncpa [#allocation3], 1 }
 0x10f   :  { %118 = vsyncpa [#allocation4], 1 }

</bundles_post_ra>
